<compile_context>
chip_gen: v6e
topology: v6e:2x2x1
jax: 0.10.0
libtpu: 0.0.40
codegen_flags: <defaults>
</compile_context>

<pallas_src>
import jax
import jax.numpy as jnp
from jax.experimental import pallas as pl
from jax.experimental.pallas import tpu as pltpu


def token_attention_kernel(x_ref, w1_ref, b1_ref, w2_ref, b2_ref,
                           out_ref, scores_ref, acc_ref):
    """Grid = (B // TB, S // TS); the sequence axis is a reduction for `out`."""
    s_idx = pl.program_id(1)

    @pl.when(s_idx == 0)
    def _init():
        acc_ref[...] = jnp.zeros_like(acc_ref)

    tb, ts, d = x_ref.shape
    x = x_ref[...]                                     # (TB, TS, D)
    x_rows = x.reshape(tb * ts, d)                     # fill MXU M with TB*TS rows

    # Linear(D, D) + SiLU — the dominant MXU matmul; bias/activation on VPU/EUP.
    h = jnp.dot(x_rows, w1_ref[...], preferred_element_type=jnp.float32)
    h = h + b1_ref[...]
    h = h * jax.nn.sigmoid(h)                          # SiLU

    # Linear(D, 1) as a VPU multiply + lane reduction (avoids an N=1 MXU
    # matmul; overlaps for free with the next tile's DxD matmul).
    s = jnp.sum(h * w2_ref[...].astype(jnp.float32), axis=-1, keepdims=True)
    s = s + b2_ref[0, 0]                               # (TB*TS, 1) f32

    # Scores: one lane-dense (1, TS) row per batch in this block.
    for b in range(tb):                                # static, small TB
        sb = s[b * ts:(b + 1) * ts, :]                 # (TS, 1)
        scores_ref[b] = sb.T.astype(scores_ref.dtype)  # (1, TS)

    # outputs accumulation: out[b] += sum_t score[b, t] * x[b, t, :]
    # (VPU multiply + sublane reduce instead of an M=1 MXU matmul.)
    acc_ref[...] += jnp.sum(x.astype(jnp.float32) * s.reshape(tb, ts, 1), axis=1)

    @pl.when(s_idx == pl.num_programs(1) - 1)
    def _finalize():
        out_ref[...] = acc_ref[...].astype(out_ref.dtype)


def _pick_tiles(B, S):
    # Sequence tile: prefer lane-dense multiples of 128 in the 256-512 range;
    # otherwise fall back to the full sequence (exact-dim exception).
    ts = S
    for cand in (512, 256, 128):
        if S % cand == 0:
            ts = cand
            break
    # Batch tile: grow MXU M towards ~256-512 rows when the sequence tile is
    # short; only when TS is sublane-aligned so in-kernel reshapes are free.
    tb = 1
    if ts % 8 == 0:
        for cand in (8, 4, 2):
            if B % cand == 0 and cand * ts <= 512:
                tb = cand
                break
    return tb, ts


def token_attention(x, w1, b1, w2, b2, *, param_dtype=None):
    """x: (B, S, D); w1: (D, D) [torch W1], b1: (D,), w2: (1, D), b2: (1,).

    param_dtype: optionally cast W1/W2 (e.g. jnp.bfloat16) to halve weight
    VMEM/HBM footprint (required for large D on v7x's 64 MiB VMEM); the matmul
    still accumulates in f32 via preferred_element_type.
    """
    B, S, D = x.shape
    TB, TS = _pick_tiles(B, S)
    w_dtype = param_dtype if param_dtype is not None else jnp.asarray(w1).dtype

    # Pre-transpose torch-style weights so the kernel computes x @ W.
    w1_t = jnp.asarray(w1).T.astype(w_dtype)                   # (D, D)
    b1_r = jnp.asarray(b1).reshape(1, D).astype(jnp.float32)   # (1, D)
    w2_r = jnp.asarray(w2).reshape(1, D).astype(w_dtype)       # (1, D) row (VPU path)
    b2_r = jnp.asarray(b2).reshape(1, 1).astype(jnp.float32)   # SMEM scalar

    xb = jnp.dtype(x.dtype).itemsize
    pb = jnp.dtype(w_dtype).itemsize
    # Explicit scoped-VMEM budget sized from the actual buffers (+ headroom).
    vmem_est = (2 * TB * TS * D * xb          # double-buffered x tile
                + 2 * D * D * pb              # W1 (constant index_map; 2 bufs by default)
                + 2 * D * 4 + 2 * D * pb      # b1, w2
                + 2 * TB * TS * xb            # scores tile
                + 2 * TB * D * xb             # outputs tile
                + TB * D * 4)                 # f32 accumulator scratch
    vmem_limit = max(min(int(vmem_est * 1.5) + (1 << 20), 100 << 20), 32 << 20)

    cost = pl.CostEstimate(
        flops=2 * B * S * D * D + 8 * B * S * D,
        transcendentals=B * S * D,            # sigmoid inside SiLU
        bytes_accessed=(x.size * xb + D * D * pb + D * 4 + D * pb + 4
                        + B * D * xb + B * S * xb),
    )

    out, scores = pl.pallas_call(
        token_attention_kernel,
        out_shape=(
            jax.ShapeDtypeStruct((B, D), x.dtype),        # outputs
            jax.ShapeDtypeStruct((B, 1, S), x.dtype),     # scores
        ),
        grid_spec=pltpu.PrefetchScalarGridSpec(
            num_scalar_prefetch=0,
            grid=(B // TB, S // TS),
            in_specs=[
                pl.BlockSpec((TB, TS, D), lambda i, j: (i, j, 0)),   # x tile
                # NOTE: constant-index weights could additionally use
                # pipeline_mode=pl.Buffered(1) to drop the redundant 2nd buffer.
                pl.BlockSpec((D, D), lambda i, j: (0, 0)),           # W1^T (resident)
                pl.BlockSpec((1, D), lambda i, j: (0, 0)),           # b1
                pl.BlockSpec((1, D), lambda i, j: (0, 0)),           # W2 row
                pl.BlockSpec(memory_space=pltpu.MemorySpace.SMEM),   # b2 scalar
            ],
            out_specs=[
                pl.BlockSpec((TB, D), lambda i, j: (i, 0)),          # outputs (acc)
                pl.BlockSpec((TB, 1, TS), lambda i, j: (i, 0, j)),   # scores
            ],
            scratch_shapes=[pltpu.VMEM((TB, D), jnp.float32)],
        ),
        compiler_params=pltpu.CompilerParams(
            dimension_semantics=("parallel", "arbitrary"),
            vmem_limit_bytes=vmem_limit,
        ),
        cost_estimate=cost,
    )(x, w1_t, b1_r, w2_r, b2_r)
    return out, scores


def token_attention_ref(x, w1, b1, w2, b2):
    # Pure-JAX reference mirroring the PyTorch module.
    h = x @ w1.T + b1
    h = h * jax.nn.sigmoid(h)
    scores = (h @ w2.T + b2).reshape(x.shape[0], x.shape[1])   # (B, S)
    scores = scores[:, None, :]                                # (B, 1, S)
    out = jnp.matmul(scores, x)[:, 0, :]                       # (B, D)
    return out, scores


if __name__ == "__main__":
    B, S, D = 2, 8, 32
    key = jax.random.PRNGKey(0)
    kx, k1, k2, k3, k4 = jax.random.split(key, 5)

    x = jax.random.normal(kx, (B, S, D), dtype=jnp.float32)
    # torch Linear shapes: (out, in) and (out,)
    w1 = jax.random.normal(k1, (D, D), dtype=jnp.float32) * 0.1
    b1 = jax.random.normal(k2, (D,), dtype=jnp.float32) * 0.1
    w2 = jax.random.normal(k3, (1, D), dtype=jnp.float32) * 0.1
    b2 = jax.random.normal(k4, (1,), dtype=jnp.float32) * 0.1

    out, scores = token_attention(x, w1, b1, w2, b2)
    out = jax.block_until_ready(out)
    scores = jax.block_until_ready(scores)

    out_ref, scores_ref = token_attention_ref(x, w1, b1, w2, b2)
    assert out.shape == (B, D) and scores.shape == (B, 1, S)
    assert jnp.allclose(out, out_ref, atol=1e-5, rtol=1e-5)
    assert jnp.allclose(scores, scores_ref, atol=1e-5, rtol=1e-5)

    print("KERNEL_OK")
</pallas_src>

<mosaic_0001>
module attributes {stable_mosaic.version = 11 : i64} {
  func.func @token_attention_kernel(%arg0: i32, %arg1: i32, %arg2: memref<2x8x32xf32, #tpu.memory_space<vmem>>, %arg3: memref<32x32xf32, #tpu.memory_space<vmem>>, %arg4: memref<1x32xf32, #tpu.memory_space<vmem>>, %arg5: memref<1x32xf32, #tpu.memory_space<vmem>>, %arg6: memref<1x1xf32, #tpu.memory_space<smem>>, %arg7: memref<2x32xf32, #tpu.memory_space<vmem>>, %arg8: memref<2x1x8xf32, #tpu.memory_space<vmem>>, %arg9: memref<2x32xf32, #tpu.memory_space<vmem>>) attributes {dimension_semantics = [#tpu.dimension_semantics<parallel>, #tpu.dimension_semantics<arbitrary>], iteration_bounds = array<i64: 1, 1>, scalar_prefetch = 0 : i64, scratch_operands = 1 : i64, tpu.core_type = #tpu.core_type<tc>, window_params = [{transform_indices = @transform_0, window_bounds = array<i64: 2, 8, 32>}, {pipeline_mode = #tpu.pipeline_mode<synchronous>, transform_indices = @transform_1, window_bounds = array<i64: 32, 32>}, {pipeline_mode = #tpu.pipeline_mode<synchronous>, transform_indices = @transform_2, window_bounds = array<i64: 1, 32>}, {pipeline_mode = #tpu.pipeline_mode<synchronous>, transform_indices = @transform_3, window_bounds = array<i64: 1, 32>}, {transform_indices = @transform_4, window_bounds = array<i64: 1, 1>}, {transform_indices = @transform_5, window_bounds = array<i64: 2, 32>}, {transform_indices = @transform_6, window_bounds = array<i64: 2, 1, 8>}]} {
    %c0_i32 = arith.constant 0 : i32
    %0 = arith.cmpi eq, %arg1, %c0_i32 : i32
    %1 = arith.extui %0 : i1 to i32
    %c0_i32_0 = arith.constant 0 : i32
    %2 = arith.cmpi ne, %1, %c0_i32_0 : i32
    scf.if %2 {
      %cst_25 = arith.constant 0.000000e+00 : f32
      %44 = vector.broadcast %cst_25 : f32 to vector<2x32xf32>
      %c0_26 = arith.constant 0 : index
      %c0_27 = arith.constant 0 : index
      %45 = vector.load %arg9[%c0_26, %c0_27] : memref<2x32xf32, #tpu.memory_space<vmem>>, vector<2x32xf32>
      tpu.vector_store %arg9[%c0_26, %c0_27], %44 {strides = array<i32>} : memref<2x32xf32, #tpu.memory_space<vmem>>, vector<2x32xf32>,
    } else {
    }
    %c0 = arith.constant 0 : index
    %c0_1 = arith.constant 0 : index
    %c0_2 = arith.constant 0 : index
    %3 = vector.load %arg2[%c0, %c0_1, %c0_2] : memref<2x8x32xf32, #tpu.memory_space<vmem>>, vector<2x8x32xf32>
    %4 = vector.shape_cast %3 : vector<2x8x32xf32> to vector<16x32xf32>
    %c0_3 = arith.constant 0 : index
    %c0_4 = arith.constant 0 : index
    %5 = vector.load %arg3[%c0_3, %c0_4] : memref<32x32xf32, #tpu.memory_space<vmem>>, vector<32x32xf32>
    %cst = arith.constant dense<0.000000e+00> : vector<16x32xf32>
    %6 = tpu.matmul %4, %5, %cst {dimension_numbers = #tpu.dot_dimension_numbers<[1], [0], [0], [1], [0, 0, 1, 1], [], []>} : vector<16x32xf32>, vector<32x32xf32>, vector<16x32xf32> -> vector<16x32xf32>
    %c0_5 = arith.constant 0 : index
    %c0_6 = arith.constant 0 : index
    %7 = vector.load %arg4[%c0_5, %c0_6] : memref<1x32xf32, #tpu.memory_space<vmem>>, vector<1x32xf32>
    %8 = vector.broadcast %7 : vector<1x32xf32> to vector<16x32xf32>
    %9 = arith.addf %6, %8 : vector<16x32xf32>
    %10 = arith.negf %9 : vector<16x32xf32>
    %11 = math.exp %10 : vector<16x32xf32>
    %cst_7 = arith.constant 1.000000e+00 : f32
    %12 = vector.broadcast %cst_7 : f32 to vector<16x32xf32>
    %13 = arith.addf %12, %11 : vector<16x32xf32>
    %14 = arith.divf %12, %13 : vector<16x32xf32>
    %15 = arith.mulf %9, %14 : vector<16x32xf32>
    %c0_8 = arith.constant 0 : index
    %c0_9 = arith.constant 0 : index
    %16 = vector.load %arg5[%c0_8, %c0_9] : memref<1x32xf32, #tpu.memory_space<vmem>>, vector<1x32xf32>
    %17 = vector.broadcast %16 : vector<1x32xf32> to vector<16x32xf32>
    %18 = arith.mulf %15, %17 : vector<16x32xf32>
    %cst_10 = arith.constant dense<0.000000e+00> : vector<16xf32>
    %19 = vector.multi_reduction <add>, %18, %cst_10 [1] : vector<16x32xf32> to vector<16xf32>
    %20 = vector.shape_cast %19 : vector<16xf32> to vector<16x1xf32>
    %c0_11 = arith.constant 0 : index
    %c0_12 = arith.constant 0 : index
    %21 = memref.load %arg6[%c0_11, %c0_12] : memref<1x1xf32, #tpu.memory_space<smem>>
    %22 = vector.broadcast %21 : f32 to vector<16x1xf32>
    %23 = arith.addf %20, %22 : vector<16x1xf32>
    %24 = vector.extract_strided_slice %23 {offsets = [0, 0], sizes = [8, 1], strides = [1, 1]} : vector<16x1xf32> to vector<8x1xf32>
    %25 = tpu.transpose %24, [1, 0] : vector<8x1xf32> -> vector<1x8xf32>
    %c0_13 = arith.constant 0 : index
    %c0_14 = arith.constant 0 : index
    %c0_15 = arith.constant 0 : index
    %26 = vector.load %arg8[%c0_13, %c0_14, %c0_15] : memref<2x1x8xf32, #tpu.memory_space<vmem>>, vector<1x1x8xf32>
    %27 = vector.shape_cast %26 : vector<1x1x8xf32> to vector<1x8xf32>
    %28 = vector.shape_cast %25 : vector<1x8xf32> to vector<1x1x8xf32>
    tpu.vector_store %arg8[%c0_13, %c0_14, %c0_15], %28 {strides = array<i32>} : memref<2x1x8xf32, #tpu.memory_space<vmem>>, vector<1x1x8xf32>,
    %29 = vector.extract_strided_slice %23 {offsets = [8, 0], sizes = [8, 1], strides = [1, 1]} : vector<16x1xf32> to vector<8x1xf32>
    %30 = tpu.transpose %29, [1, 0] : vector<8x1xf32> -> vector<1x8xf32>
    %c1 = arith.constant 1 : index
    %c0_16 = arith.constant 0 : index
    %c0_17 = arith.constant 0 : index
    %31 = vector.load %arg8[%c1, %c0_16, %c0_17] : memref<2x1x8xf32, #tpu.memory_space<vmem>>, vector<1x1x8xf32>
    %32 = vector.shape_cast %31 : vector<1x1x8xf32> to vector<1x8xf32>
    %33 = vector.shape_cast %30 : vector<1x8xf32> to vector<1x1x8xf32>
    tpu.vector_store %arg8[%c1, %c0_16, %c0_17], %33 {strides = array<i32>} : memref<2x1x8xf32, #tpu.memory_space<vmem>>, vector<1x1x8xf32>,
    %c0_18 = arith.constant 0 : index
    %c0_19 = arith.constant 0 : index
    %34 = vector.load %arg9[%c0_18, %c0_19] : memref<2x32xf32, #tpu.memory_space<vmem>>, vector<2x32xf32>
    %35 = vector.shape_cast %23 : vector<16x1xf32> to vector<2x8x1xf32>
    %36 = vector.broadcast %35 : vector<2x8x1xf32> to vector<2x8x32xf32>
    %37 = arith.mulf %3, %36 : vector<2x8x32xf32>
    %cst_20 = arith.constant dense<0.000000e+00> : vector<2x32xf32>
    %38 = vector.multi_reduction <add>, %37, %cst_20 [1] : vector<2x8x32xf32> to vector<2x32xf32>
    %39 = arith.addf %34, %38 : vector<2x32xf32>
    %c0_21 = arith.constant 0 : index
    %c0_22 = arith.constant 0 : index
    %40 = vector.load %arg9[%c0_21, %c0_22] : memref<2x32xf32, #tpu.memory_space<vmem>>, vector<2x32xf32>
    tpu.vector_store %arg9[%c0_21, %c0_22], %39 {strides = array<i32>} : memref<2x32xf32, #tpu.memory_space<vmem>>, vector<2x32xf32>,
    %c0_i32_23 = arith.constant 0 : i32
    %41 = arith.cmpi eq, %arg1, %c0_i32_23 : i32
    %42 = arith.extui %41 : i1 to i32
    %c0_i32_24 = arith.constant 0 : i32
    %43 = arith.cmpi ne, %42, %c0_i32_24 : i32
    scf.if %43 {
      %c0_25 = arith.constant 0 : index
      %c0_26 = arith.constant 0 : index
      %44 = vector.load %arg9[%c0_25, %c0_26] : memref<2x32xf32, #tpu.memory_space<vmem>>, vector<2x32xf32>
      %c0_27 = arith.constant 0 : index
      %c0_28 = arith.constant 0 : index
      %45 = vector.load %arg7[%c0_27, %c0_28] : memref<2x32xf32, #tpu.memory_space<vmem>>, vector<2x32xf32>
      tpu.vector_store %arg7[%c0_27, %c0_28], %44 {strides = array<i32>} : memref<2x32xf32, #tpu.memory_space<vmem>>, vector<2x32xf32>,
    } else {
    }
    return
  }
  func.func @transform_0(%arg0: i32, %arg1: i32) -> (i32, i32, i32) {
    %c0_i32 = arith.constant 0 : i32
    %c0_i32_0 = arith.constant 0 : i32
    return %arg0, %arg1, %c0_i32 : i32, i32, i32
  }
  func.func @transform_1(%arg0: i32, %arg1: i32) -> (i32, i32) {
    %c0_i32 = arith.constant 0 : i32
    %c0_i32_0 = arith.constant 0 : i32
    %c0_i32_1 = arith.constant 0 : i32
    return %c0_i32, %c0_i32_0 : i32, i32
  }
  func.func @transform_2(%arg0: i32, %arg1: i32) -> (i32, i32) {
    %c0_i32 = arith.constant 0 : i32
    %c0_i32_0 = arith.constant 0 : i32
    %c0_i32_1 = arith.constant 0 : i32
    return %c0_i32, %c0_i32_0 : i32, i32
  }
  func.func @transform_3(%arg0: i32, %arg1: i32) -> (i32, i32) {
    %c0_i32 = arith.constant 0 : i32
    %c0_i32_0 = arith.constant 0 : i32
    %c0_i32_1 = arith.constant 0 : i32
    return %c0_i32, %c0_i32_0 : i32, i32
  }
  func.func @transform_4(%arg0: i32, %arg1: i32) -> (i32, i32) {
    %c0_i32 = arith.constant 0 : i32
    %c0_i32_0 = arith.constant 0 : i32
    %c0_i32_1 = arith.constant 0 : i32
    return %c0_i32, %c0_i32_0 : i32, i32
  }
  func.func @transform_5(%arg0: i32, %arg1: i32) -> (i32, i32) {
    %c0_i32 = arith.constant 0 : i32
    %c0_i32_0 = arith.constant 0 : i32
    return %arg0, %c0_i32 : i32, i32
  }
  func.func @transform_6(%arg0: i32, %arg1: i32) -> (i32, i32, i32) {
    %c0_i32 = arith.constant 0 : i32
    %c0_i32_0 = arith.constant 0 : i32
    return %arg0, %c0_i32, %arg1 : i32, i32, i32
  }
}

</mosaic_0001>

<bundles_post_ra>
// kernel: tpu_custom_call.1
= control target key start
LH: loop header
LB: loop body
LE: loop exit
PB: predicated region body
PF: predicated region fallthrough
CT: control target
= control target key end

     0   :  { %13 = vsyncpa [#allocation5], 0  ;;  %s519_s0 = inlined_call_operand.hbm [shape: f32[2,8,32], index: 0, kind: input, shape index: {}]   ;;  %s520_s1 = inlined_call_operand.hbm [shape: f32[32,32], index: 1, kind: input, shape index: {}]   ;;  %s521_s2 = inlined_call_operand.vmem [shape: f32[1,32], index: 2, kind: input, shape index: {}]   ;;  %s522_s3 = inlined_call_operand.vmem [shape: f32[1,32], index: 3, kind: input, shape index: {}]   ;;  %s523_s4 = inlined_call_operand.<no memory space> [shape: f32[1,1], index: 4, kind: input, shape index: {}]   ;;  %s524_s5 = inlined_call_operand.hbm [shape: f32[2,32], index: 5, kind: output, shape index: {0}]   ;;  %s525_s6 = inlined_call_operand.hbm [shape: f32[2,1,8], index: 6, kind: output, shape index: {1}]  }
   0x1   :  { %14 = vsyncpa [#allocation8], 0 }
   0x2   :  { %15 = vsyncpa [#allocation6], 0 }
   0x3   :  { %16 = vsyncpa [#allocation11], 0  ;;  %s445_s21 = smov [#allocation4]  }
   0x4   :  { %s22_s22 = sshll.u32 %s445_s21, 4  ;;  %s23_s22 = int_to_ptr.vmem [resolvable:$true] %s22_s22 }
   0x5   :  { %s365_s23 = scalar_lea.vmem %s23_s22, 256  ;;  %p370_p1 = scmp.lt.s32.totalorder %s23_s22, %s23_s22 }
   0x6   :  { %p366_p0 = scmp.ne.s32.totalorder %s23_s22, %s365_s23  ;;  %p371_p2 = scmp.lt.s32.totalorder %s365_s23, %s365_s23 }
   0x8   :  { %p372_p3 = por %p371_p2, %p370_p1 }
   0xa   :  { %p373_p4 = pnand %p372_p3, %p366_p0 }
   0xc   :  { %376 = shalt.err (!%p373_p4)
}
   0xd   :  { %s446_s24 = smov 128   ;;  %s447_s25 = smov 8  }
   0xe   :  { %28 = dma.hbm_to_vmem [thread:$0]  %s519_s0, 256, %s23_s22, [#allocation5], %s446_s24, %s446_s24, %s447_s25  }
   0xf   :  { %s448_s28 = smov [#allocation7]  }
  0x10   :  { %s34_s29 = sshll.u32 %s448_s28, 4  ;;  %s35_s29 = int_to_ptr.vmem [resolvable:$true] %s34_s29 }
  0x11   :  { %s385_s30 = scalar_lea.vmem %s35_s29, 512  ;;  %p390_p6 = scmp.lt.s32.totalorder %s35_s29, %s35_s29 }
  0x12   :  { %p386_p5 = scmp.ne.s32.totalorder %s35_s29, %s385_s30  ;;  %p391_p7 = scmp.lt.s32.totalorder %s385_s30, %s385_s30 }
  0x14   :  { %p392_p8 = por %p391_p7, %p390_p6 }
  0x16   :  { %p393_p9 = pnand %p392_p8, %p386_p5 }
  0x18   :  { %396 = shalt.err (!%p393_p9)
}
  0x19   :  { %40 = dma.hbm_to_vmem [thread:$0]  %s520_s1, 512, %s35_s29, [#allocation8], %s446_s24, %s446_s24, %s447_s25  }
  0x1a   :  { %437 = dma.done.wait [#allocation5], 256  }
  0x1b   :  { %438 = vsyncadd [#allocation5], 4294967040 }
  0x1c   :  { %439 = dma.done.wait [#allocation8], 512  }
  0x1d   :  { %440 = vsyncadd [#allocation8], 4294966784  ;;  %vm72_vm0 = vcmask 261120   ;;  %v64_v0 = vld [vmem:[#allocation7 + $0x18] sm:$0xff]  ;;  %v63_v1 = vld [vmem:[#allocation7 + $0x10] sm:$0xff]  ;;  %vm57_vm1 = vcmask 254976   ;;  %v184_v27 = vstv %s523_s4 }
  0x1e   :  { %329 = vmatprep.subr.mxu0 %v64_v0  ;;  %v59_v2 = vld [vmem:[#allocation4] sm:$0xff]  ;;  %v62_v3 = vld [vmem:[#allocation7 + $0x8] sm:$0xff]  ;;  %v61_v4 = vld [vmem:[#allocation7] sm:$0xff]  ;;  %v449_v26 = vmov 0.0   ;;  %vm274_vm2 = vcmask 1041409  }
  0x1f   :  { %330 = vmatpush3.msra.mxu0 %v64_v0  ;;  %337 = vmatprep.mubr.msk.f32.mxu0 %vm72_vm0, %v59_v2  ;;  %v60_v5 = vld [vmem:[#allocation4 + $0x8] sm:$0xff]  ;;  %v317_v6 = vld [vmem:[%s521_s2] ss:$0 sm:$0xff]  ;;  %58 = vst.msk [vmem:[#allocation2] sm:$0x3] %vm57_vm1, %v449_v26 }
  0x20   :  { %331 = vmatprep.subr.mxu0 %v63_v1  ;;  %v322_v21 = vld [vmem:[%s522_s3] ss:$0 sm:$0xff]  ;;  %s450_s3 = smov [#allocation9]  }
  0x21   :  { %332 = vmatpush3.msra.mxu0 %v63_v1  ;;  %s291_s4 = sshll.u32 %s450_s3, 4  ;;  %s292_s4 = int_to_ptr.vmem [resolvable:$true] %s291_s4 }
  0x22   :  { %333 = vmatprep.subr.mxu0 %v62_v3  ;;  %s397_s12 = scalar_lea.vmem %s292_s4, 32  ;;  %p402_p11 = scmp.lt.s32.totalorder %s292_s4, %s292_s4 }
  0x23   :  { %334 = vmatpush3.msra.mxu0 %v62_v3  ;;  %p398_p10 = scmp.ne.s32.totalorder %s292_s4, %s397_s12  ;;  %p403_p12 = scmp.lt.s32.totalorder %s397_s12, %s397_s12 }
  0x24   :  { %335 = vmatprep.subr.mxu0 %v61_v4 }
  0x25   :  { %336 = vmatpush3.msra.mxu0 %v61_v4  ;;  %p404_p13 = por %p403_p12, %p402_p11 }
  0x26   :  { %338 = vmatmul.mubr.msk.f32.vlgmr.msra.gmra.mxu0 %vm72_vm0, %v60_v5  ;;  %v255_v48 = vld [vmem:[#allocation2] sm:$0x3] }
  0x27   :  { %p405_p0 = pnand %p404_p13, %p398_p10 }
  0xe6   :  { %v339_v7 = vpop.f32.mrf.mxu0 }
  0xe7   :  { %v151_v8 = vadd.f32 %v339_v7, %v317_v6 }
  0xe8   :  { %v145_v9 = vpop.f32.mrf.mxu0 }
  0xe9   :  { %v321_v10 = vmul.f32 -1.442695, %v151_v8  ;;  %v146_v11 = vadd.f32 %v317_v6, %v145_v9 }
  0xeb   :  { %349 = vpow2.f32 %v321_v10  ;;  %v320_v12 = vmul.f32 -1.442695, %v146_v11 }
  0xed   :  { %351 = vpow2.f32 %v320_v12 }
  0xf8   :  { %v350_v13 = vpop.eup %349 }
  0xf9   :  { %v161_v14 = vadd.f32 1.0, %v350_v13 }
  0xfa   :  { %v352_v15 = vpop.eup %351 }
  0xfb   :  { %353 = vrcp.f32 %v161_v14  ;;  %v160_v16 = vadd.f32 1.0, %v352_v15 }
  0xfd   :  { %355 = vrcp.f32 %v160_v16 }
 0x108   :  { %v354_v17 = vpop.eup %353 }
 0x109   :  { %v167_v19 = vmul.f32 %v354_v17, %v151_v8 }
 0x10a   :  { %v356_v18 = vpop.eup %355 }
 0x10b   :  { %v166_v20 = vmul.f32 %v356_v18, %v146_v11  ;;  %v176_v24 = vmul.f32 %v322_v21, %v167_v19 }
 0x10d   :  { %v175_v22 = vmul.f32 %v322_v21, %v166_v20  ;;  %v180_v25 = vsel %vm72_vm0, %v176_v24, 0.0 }
 0x10f   :  { %v177_v23 = vsel %vm72_vm0, %v175_v22, 0.0 }
 0x110   :  { %178 = vadd.xlane.f32.xlu0 %v177_v23 }
 0x114   :  { %181 = vadd.xlane.f32.xlu0 %v180_v25 }
 0x199   :  { %v179_v28 = vpop.xlane.xlu0 %178 }
 0x19a   :  { %v185_v29 = vadd.f32 %v184_v27, %v179_v28 }
 0x19c   :  { %v256_v30 = vmul.f32 %v185_v29, %v59_v2  ;;  %187 = vxpose.xlu1.b32.start.end [1/1] (short) (narrow) %v185_v29, 8 }
 0x19d   :  { %v182_v31 = vpop.xlane.xlu0 %181 }
 0x19e   :  { %v258_v32 = vsel %vm72_vm0, %v256_v30, 0.0  ;;  %v186_v33 = vadd.f32 %v184_v27, %v182_v31 }
 0x19f   :  { %v259_v34 = vrot.slane %v258_v32, 4 }
 0x1a0   :  { %v257_v35 = vmul.f32 %v186_v33, %v60_v5  ;;  %221 = vxpose.xlu1.b32.start.end [1/1] (short) (narrow) %v186_v33, 8 }
 0x1a1   :  { %v260_v36 = vadd.f32 %v259_v34, %v258_v32 }
 0x1a2   :  { %v265_v37 = vsel %vm72_vm0, %v257_v35, 0.0 }
 0x1a3   :  { %v261_v38 = vrot.slane %v260_v36, 2  ;;  %v266_v39 = vrot.slane %v265_v37, 4 }
 0x1a5   :  { %v262_v40 = vadd.f32 %v261_v38, %v260_v36  ;;  %v267_v41 = vadd.f32 %v266_v39, %v265_v37 }
 0x1a7   :  { %v268_v42 = vrot.slane %v267_v41, 2  ;;  %v263_v43 = vrot.slane %v262_v40, 1 }
 0x1a9   :  { %v269_v44 = vadd.f32 %v268_v42, %v267_v41  ;;  %v264_v46 = vadd.f32 %v263_v43, %v262_v40 }
 0x1ab   :  { %v270_v45 = vrot.slane %v269_v44, 1 }
 0x1ad   :  { %v271_v47 = vadd.f32 %v270_v45, %v269_v44 }
 0x1af   :  { %v275_v49 = vsel %vm274_vm2, %v271_v47, %v264_v46 }
 0x1b0   :  { %v277_v50 = vadd.f32 %v275_v49, %v255_v48 }
 0x1b2   :  { %279 = vst.msk [vmem:[#allocation2] sm:$0x3] %vm57_vm1, %v277_v50 }
 0x1b9   :  { %v283_v51 = vld [vmem:[#allocation2] sm:$0x3] }
 0x1ba   :  { %284 = vst.msk [vmem:[#allocation9] sm:$0x3] %vm57_vm1, %v283_v51 }
 0x1bb   :  { %408 = shalt.err (!%p405_p0)
}
 0x1bc   :  { %294 = dma.vmem_to_hbm [thread:$0]  %s292_s4, 32, %s524_s5, [#allocation6]   ;;  %vm219_vm3 = vcmask 57344  }
 0x1bd   :  { %s451_s15 = smov [#allocation10]  }
 0x1be   :  { %s300_s16 = sshll.u32 %s451_s15, 4  ;;  %s301_s16 = int_to_ptr.vmem [resolvable:$true] %s300_s16 }
 0x1bf   :  { %s417_s17 = scalar_lea.vmem %s301_s16, 32  ;;  %p422_p2 = scmp.lt.s32.totalorder %s301_s16, %s301_s16 }
 0x1c0   :  { %p418_p1 = scmp.ne.s32.totalorder %s301_s16, %s417_s17  ;;  %p423_p3 = scmp.lt.s32.totalorder %s417_s17, %s417_s17 }
 0x1c2   :  { %p424_p4 = por %p423_p3, %p422_p2 }
 0x1c4   :  { %p425_p5 = pnand %p424_p4, %p418_p1 }
 0x218   :  { %v203_v52 = vpop.trf.xlu1 }
 0x219   :  { %220 = vst.msk [vmem:[#allocation10] sm:$0x1] %vm219_vm3, %v203_v52 }
 0x21c   :  { %v237_v53 = vpop.trf.xlu1 }
 0x21d   :  { %254 = vst.msk [vmem:[#allocation10 + $0x1] sm:$0x1] %vm219_vm3, %v237_v53 }
 0x21e   :  { %428 = shalt.err (!%p425_p5)
}
 0x21f   :  { %s452_s18 = smov 16   ;;  %s453_s19 = smov 1  }
 0x220   :  { %306 = dma.vmem_to_hbm [thread:$0]  %s301_s16, 32, %s525_s6, [#allocation11], %s452_s18, %s452_s18, %s453_s19  }
 0x221   :  { %441 = dma.done.wait [#allocation6], 32  }
 0x222   :  { %442 = vsyncadd [#allocation6], 4294967264 }
 0x223   :  { %443 = dma.done.wait [#allocation11], 32  }
 0x224   :  { %444 = vsyncadd [#allocation11], 4294967264 }
 0x225   :  { %313 = vsyncpa [#allocation5], 1 }
 0x226   :  { %314 = vsyncpa [#allocation8], 1 }
 0x227   :  { %315 = vsyncpa [#allocation6], 1 }
 0x228   :  { %316 = vsyncpa [#allocation11], 1 }

</bundles_post_ra>
